<compile_context>
chip_gen: v7x
topology: tpu7x:2x2x1
jax: 0.10.0
libtpu: 0.0.40
codegen_flags: <defaults>
</compile_context>

<pallas_src>
from functools import partial

import jax
import jax.numpy as jnp
from jax.experimental import pallas as pl
from jax.experimental.pallas import tpu as pltpu

CHANNELS = 3
HEIGHT = 32
WIDTH = 32
SIZE = WIDTH * HEIGHT * CHANNELS  # 3072

H1 = 100
H2 = 30
H3 = 10
N_PAD = 128          # lane-dense padded output width
BF16_SUBLANE = 16    # bf16 sublane tile: second-to-last block dim multiple


def _round_up(x, m):
    return ((x + m - 1) // m) * m


def _fused_mlp_softmax_kernel(x_ref, w_ref, b_ref, o_ref):
    # (TB, 3072) bf16 @ (3072, 128) bf16 -> f32 accumulation on the MXU,
    # then bias add and softmax entirely in f32.
    logits = jnp.dot(x_ref[...], w_ref[...],
                     preferred_element_type=jnp.float32) + b_ref[...]
    # Numerically stable softmax over the last dim. Padded columns carry a -1e30
    # f32 bias, so exp() underflows to exactly 0 and they add nothing to the sum.
    m = jnp.max(logits, axis=-1, keepdims=True)
    e = jnp.exp(logits - m)
    denom = jnp.sum(e, axis=-1, keepdims=True)
    # Exact divide (kernel is DMA-bound, the exact op is free) so that the real
    # 10 columns sum to 1 up to f32 rounding.
    o_ref[...] = e / denom


@partial(jax.jit, static_argnames=("tb",))
def net_forward(x_nchw, params, *, tb=1024):
    """x_nchw: (B, 3, 32, 32) float32. Returns (B, 10) softmax probabilities."""
    w1, b1, w2, b2, w3, b3 = params
    b = x_nchw.shape[0]
    # Same as torch .view(-1, SIZE); cast to bf16 to halve the dominant HBM stream.
    x = x_nchw.reshape(b, SIZE).astype(jnp.bfloat16)

    # ---- Algebraic fusion of the three Linear layers (valid: no activation
    # between them in the original module).  Done once, in f32, outside the kernel.
    w_fused = (w1 @ w2) @ w3                  # (3072, 10)
    bias_fused = (b1 @ w2 + b2) @ w3 + b3     # (1, 10)

    # Pad N: 10 -> 128.  Zero bf16 weights + -1e30 f32 bias => padded logits never
    # win the softmax and exp() underflows to exactly 0, so the first 10 cols are
    # exact.  Bias/sentinel stays f32.
    w_pad = jnp.zeros((SIZE, N_PAD), jnp.bfloat16).at[:, :H3].set(
        w_fused.astype(jnp.bfloat16))
    bias_pad = jnp.full((1, N_PAD), -1e30, jnp.float32).at[:, :H3].set(bias_fused)

    # ---- Batch tiling.  No wrapper-side jnp.pad of x: grid = ceil(b / tb) and the
    # ragged last block is masked by Pallas (rows are independent; OOB output rows
    # are dropped).  For b > 16, cap tb so the grid has >= 2 steps and the
    # "parallel" axis shards across v7x's two TensorCores.
    if b <= BF16_SUBLANE:
        tb_eff = b  # single full-extent block; no (16,128) tiling issue
    else:
        tb_eff = max(BF16_SUBLANE,
                     min(int(tb), _round_up(pl.cdiv(b, 2), BF16_SUBLANE)))
    grid = (pl.cdiv(b, tb_eff),)

    # Right-size scoped VMEM: double-buffered bf16 x tile + weights/bias + f32 out
    # tile + softmax intermediates.  Cap at 56 MiB so it also fits v7x (64 MiB/TC).
    need = (2 * tb_eff * SIZE * 2          # x (bf16, double buffered)
            + 2 * SIZE * N_PAD * 2         # fused W (bf16)
            + 2 * N_PAD * 4                # fused bias (f32)
            + 2 * tb_eff * N_PAD * 4       # out (f32, double buffered)
            + 2 * tb_eff * N_PAD * 4)      # logits + exp temporaries (f32)
    vmem_limit = int(min(need + (8 << 20), 56 << 20))

    cost = pl.CostEstimate(
        flops=2 * b * SIZE * N_PAD,
        transcendentals=b * N_PAD,
        bytes_accessed=b * SIZE * 2 + SIZE * N_PAD * 2 + N_PAD * 4 + b * N_PAD * 4,
    )

    out = pl.pallas_call(
        _fused_mlp_softmax_kernel,
        out_shape=jax.ShapeDtypeStruct((b, N_PAD), jnp.float32),
        grid=grid,
        in_specs=[
            pl.BlockSpec((tb_eff, SIZE), lambda i: (i, 0)),   # x tile (pipelined)
            pl.BlockSpec((SIZE, N_PAD), lambda i: (0, 0)),    # fused W (resident)
            pl.BlockSpec((1, N_PAD), lambda i: (0, 0)),       # fused bias (resident)
        ],
        out_specs=pl.BlockSpec((tb_eff, N_PAD), lambda i: (i, 0)),
        compiler_params=pltpu.CompilerParams(
            dimension_semantics=("parallel",),
            vmem_limit_bytes=vmem_limit,
        ),
        cost_estimate=cost,
    )(x, w_pad, bias_pad)

    return out[:, :H3]


def init_params(key):
    """Deterministic synthetic parameters (same shapes as the nn.Linear layers)."""
    k1, k2, k3, k4, k5, k6 = jax.random.split(key, 6)

    # torch default init: U(-1/sqrt(fan_in), 1/sqrt(fan_in))
    def lin(kw, kb, fan_in, fan_out):
        lim = 1.0 / jnp.sqrt(jnp.float32(fan_in))
        w = jax.random.uniform(kw, (fan_in, fan_out), jnp.float32, -lim, lim)
        b_ = jax.random.uniform(kb, (1, fan_out), jnp.float32, -lim, lim)
        return w, b_

    w1, b1 = lin(k1, k2, SIZE, H1)
    w2, b2 = lin(k3, k4, H1, H2)
    w3, b3 = lin(k5, k6, H2, H3)
    return (w1, b1, w2, b2, w3, b3)


def _reference(x_nchw, params):
    w1, b1, w2, b2, w3, b3 = params
    x = x_nchw.reshape(x_nchw.shape[0], SIZE)
    h = x @ w1 + b1
    h = h @ w2 + b2
    h = h @ w3 + b3
    return jax.nn.softmax(h, axis=1)


if __name__ == "__main__":
    key = jax.random.PRNGKey(0)
    kx, kp = jax.random.split(key)
    batch = 4
    x = jax.random.normal(kx, (batch, CHANNELS, HEIGHT, WIDTH), jnp.float32)
    params = init_params(kp)

    out = net_forward(x, params)
    jax.block_until_ready(out)

    ref = _reference(x, params)
    assert out.shape == (batch, H3)
    # Tolerance accounts for bf16 matmul inputs + fused-layer FP reassociation
    # (accumulation and softmax are f32, so errors stay well below this bound).
    assert jnp.allclose(out, ref, atol=5e-3, rtol=5e-3), "mismatch vs reference"
    # Exact f32 divide in the kernel => rows sum to 1 to f32 precision.
    assert jnp.allclose(jnp.sum(out, axis=1), 1.0, atol=1e-3), "softmax rows must sum to 1"

    print("KERNEL_OK")
</pallas_src>

<mosaic_0001>
module attributes {stable_mosaic.version = 11 : i64} {
  func.func @_fused_mlp_softmax_kernel(%arg0: i32, %arg1: memref<4x3072xbf16, #tpu.memory_space<vmem>>, %arg2: memref<3072x128xbf16, #tpu.memory_space<vmem>>, %arg3: memref<1x128xf32, #tpu.memory_space<vmem>>, %arg4: memref<4x128xf32, #tpu.memory_space<vmem>>) attributes {dimension_semantics = [#tpu.dimension_semantics<parallel>], iteration_bounds = array<i64: 1>, scalar_prefetch = 0 : i64, scratch_operands = 0 : i64, tpu.core_type = #tpu.core_type<tc>, window_params = [{transform_indices = @transform_0, window_bounds = array<i64: 4, 3072>}, {pipeline_mode = #tpu.pipeline_mode<synchronous>, transform_indices = @transform_1, window_bounds = array<i64: 3072, 128>}, {pipeline_mode = #tpu.pipeline_mode<synchronous>, transform_indices = @transform_2, window_bounds = array<i64: 1, 128>}, {transform_indices = @transform_3, window_bounds = array<i64: 4, 128>}]} {
    %c0 = arith.constant 0 : index
    %c0_0 = arith.constant 0 : index
    %0 = vector.load %arg1[%c0, %c0_0] : memref<4x3072xbf16, #tpu.memory_space<vmem>>, vector<4x3072xbf16>
    %c0_1 = arith.constant 0 : index
    %c0_2 = arith.constant 0 : index
    %1 = vector.load %arg2[%c0_1, %c0_2] : memref<3072x128xbf16, #tpu.memory_space<vmem>>, vector<3072x128xbf16>
    %cst = arith.constant dense<0.000000e+00> : vector<4x128xf32>
    %2 = tpu.matmul %0, %1, %cst {dimension_numbers = #tpu.dot_dimension_numbers<[1], [0], [0], [1], [0, 0, 1, 1], [], []>} : vector<4x3072xbf16>, vector<3072x128xbf16>, vector<4x128xf32> -> vector<4x128xf32>
    %c0_3 = arith.constant 0 : index
    %c0_4 = arith.constant 0 : index
    %3 = vector.load %arg3[%c0_3, %c0_4] : memref<1x128xf32, #tpu.memory_space<vmem>>, vector<1x128xf32>
    %4 = vector.broadcast %3 : vector<1x128xf32> to vector<4x128xf32>
    %5 = arith.addf %2, %4 : vector<4x128xf32>
    %cst_5 = arith.constant dense<0xFF800000> : vector<4xf32>
    %6 = vector.multi_reduction <maximumf>, %5, %cst_5 [1] : vector<4x128xf32> to vector<4xf32>
    %7 = vector.shape_cast %6 : vector<4xf32> to vector<4x1xf32>
    %8 = vector.broadcast %7 : vector<4x1xf32> to vector<4x128xf32>
    %9 = arith.subf %5, %8 : vector<4x128xf32>
    %10 = math.exp %9 : vector<4x128xf32>
    %cst_6 = arith.constant dense<0.000000e+00> : vector<4xf32>
    %11 = vector.multi_reduction <add>, %10, %cst_6 [1] : vector<4x128xf32> to vector<4xf32>
    %12 = vector.shape_cast %11 : vector<4xf32> to vector<4x1xf32>
    %13 = vector.broadcast %12 : vector<4x1xf32> to vector<4x128xf32>
    %14 = arith.divf %10, %13 : vector<4x128xf32>
    %c0_7 = arith.constant 0 : index
    %c0_8 = arith.constant 0 : index
    %15 = vector.load %arg4[%c0_7, %c0_8] : memref<4x128xf32, #tpu.memory_space<vmem>>, vector<4x128xf32>
    tpu.vector_store %arg4[%c0_7, %c0_8], %14 {strides = array<i32>} : memref<4x128xf32, #tpu.memory_space<vmem>>, vector<4x128xf32>,
    return
  }
  func.func @transform_0(%arg0: i32) -> (i32, i32) {
    %c0_i32 = arith.constant 0 : i32
    %c0_i32_0 = arith.constant 0 : i32
    return %arg0, %c0_i32 : i32, i32
  }
  func.func @transform_1(%arg0: i32) -> (i32, i32) {
    %c0_i32 = arith.constant 0 : i32
    %c0_i32_0 = arith.constant 0 : i32
    %c0_i32_1 = arith.constant 0 : i32
    return %c0_i32, %c0_i32_0 : i32, i32
  }
  func.func @transform_2(%arg0: i32) -> (i32, i32) {
    %c0_i32 = arith.constant 0 : i32
    %c0_i32_0 = arith.constant 0 : i32
    %c0_i32_1 = arith.constant 0 : i32
    return %c0_i32, %c0_i32_0 : i32, i32
  }
  func.func @transform_3(%arg0: i32) -> (i32, i32) {
    %c0_i32 = arith.constant 0 : i32
    %c0_i32_0 = arith.constant 0 : i32
    return %arg0, %c0_i32 : i32, i32
  }
}

</mosaic_0001>

<bundles_post_ra>
// kernel: net_forward.1
= control target key start
LH: loop header
LB: loop body
LE: loop exit
PB: predicated region body
PF: predicated region fallthrough
CT: control target
= control target key end

     0   :  { %v423_v28 = vlaneseq  ;;  %v2889_v36 = vmov 1983009808   ;;  %s3534_s0 = inlined_call_operand.vmem [shape: bf16[4,3072], index: 0, kind: input, shape index: {}]   ;;  %s3535_s1 = inlined_call_operand.vmem [shape: bf16[3072,128], index: 1, kind: input, shape index: {}]   ;;  %s3536_s2 = inlined_call_operand.vmem [shape: f32[1,128], index: 2, kind: input, shape index: {}]   ;;  %s3537_s3 = inlined_call_operand.hbm [shape: f32[4,128], index: 3, kind: output, shape index: {}]  }
   0x1   :  { %v2663_v0 = vld [vmem:[%s3535_s1 + $0x40] sm:$0xff]   ;;  %v2667_v4 = vld [vmem:[%s3535_s1 + $0x48] sm:$0xff]   ;;  %v2671_v8 = vld [vmem:[%s3535_s1 + $0x50] sm:$0xff]   ;;  %v421_v37 = vunpack.c.l.s4 %v2889_v36 }
   0x2   :  { %v2664_v1 = vld [vmem:[%s3535_s1 + $0xc0] sm:$0xff]   ;;  %2397 = vmatprep.subr.bf16.mxu0 %v2663_v0  ;;  %v2668_v5 = vld [vmem:[%s3535_s1 + $0xc8] sm:$0xff]   ;;  %v2672_v9 = vld [vmem:[%s3535_s1 + $0xd0] sm:$0xff]   ;;  %v424_v33 = vshrl.u32 %v423_v28, 7 }
   0x3   :  { %v2665_v2 = vld [vmem:[%s3535_s1] sm:$0xff]   ;;  %2419 = vmatprep.subr.bf16.mxu1 %v2664_v1  ;;  %v2669_v6 = vld [vmem:[%s3535_s1 + $0x8] sm:$0xff]   ;;  %v2673_v10 = vld [vmem:[%s3535_s1 + $0x10] sm:$0xff]   ;;  %v422_v39 = vunpack.c.0.s8 %v421_v37 }
   0x4   :  { %v2666_v3 = vld [vmem:[%s3535_s1 + $0x80] sm:$0xff]   ;;  %2398 = vmatpush3.bf16.msra.mxu0 %v2665_v2  ;;  %v2670_v7 = vld [vmem:[%s3535_s1 + $0x88] sm:$0xff]   ;;  %v2674_v11 = vld [vmem:[%s3535_s1 + $0x90] sm:$0xff]  }
   0x5   :  { %2420 = vmatpush3.bf16.msra.mxu1 %v2666_v3  ;;  %2399 = vmatprep.subr.bf16.mxu0 %v2667_v4  ;;  %v2675_v12 = vld [vmem:[%s3535_s1 + $0x58] sm:$0xff]   ;;  %v2679_v16 = vld [vmem:[%s3535_s1 + $0x60] sm:$0xff]   ;;  %v2683_v20 = vld [vmem:[%s3535_s1 + $0x68] sm:$0xff]   ;;  %v3016_v41 = vsub.s32 %v422_v39, %v424_v33 }
   0x6   :  { %2421 = vmatprep.subr.bf16.mxu1 %v2668_v5  ;;  %v2676_v13 = vld [vmem:[%s3535_s1 + $0xd8] sm:$0xff]   ;;  %v2680_v17 = vld [vmem:[%s3535_s1 + $0xe0] sm:$0xff]   ;;  %v2684_v21 = vld [vmem:[%s3535_s1 + $0xe8] sm:$0xff]  }
   0x7   :  { %v2677_v14 = vld [vmem:[%s3535_s1 + $0x18] sm:$0xff]   ;;  %v2681_v18 = vld [vmem:[%s3535_s1 + $0x20] sm:$0xff]   ;;  %v2685_v22 = vld [vmem:[%s3535_s1 + $0x28] sm:$0xff]  }
   0x8   :  { %2400 = vmatpush3.bf16.msra.mxu0 %v2669_v6  ;;  %v2678_v15 = vld [vmem:[%s3535_s1 + $0x98] sm:$0xff]   ;;  %v2682_v19 = vld [vmem:[%s3535_s1 + $0xa0] sm:$0xff]   ;;  %v2686_v23 = vld [vmem:[%s3535_s1 + $0xa8] sm:$0xff]  }
   0x9   :  { %2422 = vmatpush3.bf16.msra.mxu1 %v2670_v7  ;;  %2401 = vmatprep.subr.bf16.mxu0 %v2671_v8  ;;  %v2687_v24 = vld [vmem:[%s3535_s1 + $0x70] sm:$0xff]   ;;  %v2691_v29 = vld [vmem:[%s3535_s1 + $0x78] sm:$0xff]   ;;  %v16_v34 = vld [vmem:[%s3534_s0] sm:$0xff] }
   0xa   :  { %2423 = vmatprep.subr.bf16.mxu1 %v2672_v9  ;;  %v2688_v25 = vld [vmem:[%s3535_s1 + $0xf0] sm:$0xff]   ;;  %v2692_v30 = vld [vmem:[%s3535_s1 + $0xf8] sm:$0xff]   ;;  %v2696_v35 = vld [vmem:[%s3535_s1 + $0x140] sm:$0xff]   ;;  %v419_v40 = vcombine.high %v16_v34, %v16_v34  ;;  %v426_v42 = vrot.slane %v16_v34, %v3016_v41 }
   0xb   :  { %v2689_v26 = vld [vmem:[%s3535_s1 + $0x30] sm:$0xff]   ;;  %v2693_v31 = vld [vmem:[%s3535_s1 + $0x38] sm:$0xff]   ;;  %v2697_v38 = vld [vmem:[%s3535_s1 + $0x1c0] sm:$0xff]  }
   0xc   :  { %2402 = vmatpush3.bf16.msra.mxu0 %v2673_v10  ;;  %v2690_v27 = vld [vmem:[%s3535_s1 + $0xb0] sm:$0xff]   ;;  %v2694_v32 = vld [vmem:[%s3535_s1 + $0xb8] sm:$0xff]   ;;  %v433_v43 = vrot.slane %v419_v40, %v3016_v41  ;;  %v2698_v44 = vld [vmem:[%s3535_s1 + $0x100] sm:$0xff]   ;;  %v434_v46 = vcombine.high %v426_v42, %v426_v42 }
   0xd   :  { %2424 = vmatpush3.bf16.msra.mxu1 %v2674_v11  ;;  %2403 = vmatprep.subr.bf16.mxu0 %v2675_v12  ;;  %v2699_v45 = vld [vmem:[%s3535_s1 + $0x180] sm:$0xff]   ;;  %v2700_v48 = vld [vmem:[%s3535_s1 + $0x148] sm:$0xff]   ;;  %v2704_v52 = vld [vmem:[%s3535_s1 + $0x150] sm:$0xff]  }
   0xe   :  { %2425 = vmatprep.subr.bf16.mxu1 %v2676_v13  ;;  %v435_v47 = vcombine.high %v433_v43, %v433_v43  ;;  %v2701_v49 = vld [vmem:[%s3535_s1 + $0x1c8] sm:$0xff]   ;;  %1729 = vmatprep.mubr.bf16.mxu0 %v434_v46  ;;  %v2705_v53 = vld [vmem:[%s3535_s1 + $0x1d0] sm:$0xff]   ;;  %v2708_v56 = vld [vmem:[%s3535_s1 + $0x158] sm:$0xff]  }
   0xf   :  { %v2702_v50 = vld [vmem:[%s3535_s1 + $0x108] sm:$0xff]   ;;  %v2706_v54 = vld [vmem:[%s3535_s1 + $0x110] sm:$0xff]   ;;  %v2709_v57 = vld [vmem:[%s3535_s1 + $0x1d8] sm:$0xff]  }
  0x10   :  { %2404 = vmatpush3.bf16.msra.mxu0 %v2677_v14  ;;  %1769 = vmatprep.mubr.bf16.mxu1 %v435_v47  ;;  %v2703_v51 = vld [vmem:[%s3535_s1 + $0x188] sm:$0xff]   ;;  %v2707_v55 = vld [vmem:[%s3535_s1 + $0x190] sm:$0xff]   ;;  %v2710_v58 = vld [vmem:[%s3535_s1 + $0x118] sm:$0xff]  }
  0x11   :  { %2426 = vmatpush3.bf16.msra.mxu1 %v2678_v15  ;;  %2405 = vmatprep.subr.bf16.mxu0 %v2679_v16  ;;  %v2711_v59 = vld [vmem:[%s3535_s1 + $0x198] sm:$0xff]   ;;  %v2712_v60 = vld [vmem:[%s3535_s1 + $0x160] sm:$0xff]   ;;  %v2716_v0 = vld [vmem:[%s3535_s1 + $0x168] sm:$0xff]  }
  0x12   :  { %2427 = vmatprep.subr.bf16.mxu1 %v2680_v17  ;;  %v2713_v61 = vld [vmem:[%s3535_s1 + $0x1e0] sm:$0xff]   ;;  %v2717_v1 = vld [vmem:[%s3535_s1 + $0x1e8] sm:$0xff]   ;;  %v2720_v4 = vld [vmem:[%s3535_s1 + $0x170] sm:$0xff]  }
  0x13   :  { %v2714_v62 = vld [vmem:[%s3535_s1 + $0x120] sm:$0xff]   ;;  %v2718_v2 = vld [vmem:[%s3535_s1 + $0x128] sm:$0xff]   ;;  %v2721_v5 = vld [vmem:[%s3535_s1 + $0x1f0] sm:$0xff]  }
  0x14   :  { %2406 = vmatpush3.bf16.msra.mxu0 %v2681_v18  ;;  %v2715_v63 = vld [vmem:[%s3535_s1 + $0x1a0] sm:$0xff]   ;;  %v2719_v3 = vld [vmem:[%s3535_s1 + $0x1a8] sm:$0xff]   ;;  %v2722_v6 = vld [vmem:[%s3535_s1 + $0x130] sm:$0xff]  }
  0x15   :  { %2428 = vmatpush3.bf16.msra.mxu1 %v2682_v19  ;;  %2407 = vmatprep.subr.bf16.mxu0 %v2683_v20  ;;  %v2723_v7 = vld [vmem:[%s3535_s1 + $0x1b0] sm:$0xff]   ;;  %v17_v8 = vld [vmem:[%s3534_s0 + $0x8] sm:$0xff]  ;;  %v2724_v9 = vld [vmem:[%s3535_s1 + $0x178] sm:$0xff]  }
  0x16   :  { %2429 = vmatprep.subr.bf16.mxu1 %v2684_v21  ;;  %v443_v10 = vrot.slane %v17_v8, %v3016_v41  ;;  %v436_v11 = vcombine.high %v17_v8, %v17_v8  ;;  %v2725_v12 = vld [vmem:[%s3535_s1 + $0x1f8] sm:$0xff]   ;;  %v2729_v18 = vld [vmem:[%s3535_s1 + $0x240] sm:$0xff]   ;;  %v2739_v28 = vld [vmem:[%s3535_s1 + $0x210] sm:$0xff]  }
  0x17   :  { %v2726_v13 = vld [vmem:[%s3535_s1 + $0x138] sm:$0xff]   ;;  %v2730_v19 = vld [vmem:[%s3535_s1 + $0x2c0] sm:$0xff]   ;;  %v2750_v39 = vld [vmem:[%s3535_s1 + $0x2e8] sm:$0xff]  }
  0x18   :  { %2408 = vmatpush3.bf16.msra.mxu0 %v2685_v22  ;;  %v451_v14 = vcombine.high %v443_v10, %v443_v10  ;;  %v450_v15 = vrot.slane %v436_v11, %v3016_v41  ;;  %v2727_v16 = vld [vmem:[%s3535_s1 + $0x1b8] sm:$0xff]   ;;  %v2731_v20 = vld [vmem:[%s3535_s1 + $0x200] sm:$0xff]   ;;  %v2733_v22 = vld [vmem:[%s3535_s1 + $0x248] sm:$0xff]  }
  0x19   :  { %2430 = vmatpush3.bf16.msra.mxu1 %v2686_v23  ;;  %2409 = vmatprep.subr.bf16.mxu0 %v2687_v24  ;;  %v2732_v21 = vld [vmem:[%s3535_s1 + $0x280] sm:$0xff]   ;;  %v2734_v23 = vld [vmem:[%s3535_s1 + $0x2c8] sm:$0xff]   ;;  %v2744_v33 = vld [vmem:[%s3535_s1 + $0x298] sm:$0xff]  }
  0x1a   :  { %2431 = vmatprep.subr.bf16.mxu1 %v2688_v25  ;;  %v452_v17 = vcombine.high %v450_v15, %v450_v15  ;;  %v2735_v24 = vld [vmem:[%s3535_s1 + $0x208] sm:$0xff]   ;;  %v2745_v34 = vld [vmem:[%s3535_s1 + $0x260] sm:$0xff]   ;;  %v2756_v46 = vld [vmem:[%s3535_s1 + $0x2b0] sm:$0xff]  }
  0x1b   :  { %v2736_v25 = vld [vmem:[%s3535_s1 + $0x288] sm:$0xff]   ;;  %v2747_v36 = vld [vmem:[%s3535_s1 + $0x220] sm:$0xff]   ;;  %v18_v47 = vld [vmem:[%s3534_s0 + $0x10] sm:$0xff] }
  0x1c   :  { %2410 = vmatpush3.bf16.msra.mxu0 %v2689_v26  ;;  %v2737_v26 = vld [vmem:[%s3535_s1 + $0x250] sm:$0xff]   ;;  %v2748_v37 = vld [vmem:[%s3535_s1 + $0x2a0] sm:$0xff]   ;;  %v2751_v40 = vld [vmem:[%s3535_s1 + $0x228] sm:$0xff]  }
  0x1d   :  { %2432 = vmatpush3.bf16.msra.mxu1 %v2690_v27  ;;  %2411 = vmatprep.subr.bf16.mxu0 %v2691_v29  ;;  %v2738_v27 = vld [vmem:[%s3535_s1 + $0x2d0] sm:$0xff]   ;;  %v2777_v8 = vld [vmem:[%s3535_s1 + $0x398] sm:$0xff]   ;;  %v2780_v11 = vld [vmem:[%s3535_s1 + $0x320] sm:$0xff]  }
  0x1e   :  { %2433 = vmatprep.subr.bf16.mxu1 %v2692_v30  ;;  %v2740_v29 = vld [vmem:[%s3535_s1 + $0x290] sm:$0xff]   ;;  %v2741_v30 = vld [vmem:[%s3535_s1 + $0x258] sm:$0xff]  }
  0x20   :  { %2412 = vmatpush3.bf16.msra.mxu0 %v2693_v31  ;;  %v2742_v31 = vld [vmem:[%s3535_s1 + $0x2d8] sm:$0xff]  }
  0x21   :  { %2434 = vmatpush3.bf16.msra.mxu1 %v2694_v32  ;;  %2441 = vmatprep.subr.bf16.mxu0 %v2696_v35  ;;  %v2743_v32 = vld [vmem:[%s3535_s1 + $0x218] sm:$0xff]   ;;  %v2746_v35 = vld [vmem:[%s3535_s1 + $0x2e0] sm:$0xff]  }
  0x22   :  { %2463 = vmatprep.subr.bf16.mxu1 %v2697_v38  ;;  %v2749_v38 = vld [vmem:[%s3535_s1 + $0x268] sm:$0xff]  }
  0x23   :  { %1730 = vmatmul.mubr.bf16.vlgmr.msra.gmra.mrb[0].mxu0 %v426_v42  ;;  %v2752_v42 = vld [vmem:[%s3535_s1 + $0x2a8] sm:$0xff]  }
  0x24   :  { %1770 = vmatmul.mubr.bf16.vlgmr.msra.gmra.mrb[0].mxu1 %v433_v43  ;;  %2442 = vmatpush3.bf16.msra.mxu0 %v2698_v44  ;;  %v2753_v43 = vld [vmem:[%s3535_s1 + $0x270] sm:$0xff]  }
  0x25   :  { %2464 = vmatpush3.bf16.msra.mxu1 %v2699_v45  ;;  %2443 = vmatprep.subr.bf16.mxu0 %v2700_v48  ;;  %v2754_v44 = vld [vmem:[%s3535_s1 + $0x2f0] sm:$0xff]   ;;  %v2757_v48 = vld [vmem:[%s3535_s1 + $0x278] sm:$0xff]  }
  0x26   :  { %2465 = vmatprep.subr.bf16.mxu1 %v2701_v49  ;;  %1809 = vmatprep.mubr.bf16.mxu0 %v451_v14  ;;  %v2755_v45 = vld [vmem:[%s3535_s1 + $0x230] sm:$0xff]   ;;  %v460_v49 = vrot.slane %v18_v47, %v3016_v41  ;;  %v2783_v14 = vld [vmem:[%s3535_s1 + $0x3e8] sm:$0xff]  }
  0x27   :  { %1849 = vmatprep.mubr.bf16.mxu1 %v452_v17  ;;  %v2786_v17 = vld [vmem:[%s3535_s1 + $0x370] sm:$0xff]  }
  0x28   :  { %2444 = vmatpush3.bf16.msra.mxu0 %v2702_v50  ;;  %v453_v50 = vcombine.high %v18_v47, %v18_v47  ;;  %v2810_v47 = vld [vmem:[%s3535_s1 + $0x498] sm:$0xff]  }
  0x29   :  { %2466 = vmatpush3.bf16.msra.mxu1 %v2703_v51  ;;  %2445 = vmatprep.subr.bf16.mxu0 %v2704_v52  ;;  %v2758_v51 = vld [vmem:[%s3535_s1 + $0x2f8] sm:$0xff]  }
  0x2a   :  { %2467 = vmatprep.subr.bf16.mxu1 %v2705_v53  ;;  %v2759_v52 = vld [vmem:[%s3535_s1 + $0x238] sm:$0xff]   ;;  %v468_v53 = vcombine.high %v460_v49, %v460_v49 }
  0x2c   :  { %2446 = vmatpush3.bf16.msra.mxu0 %v2706_v54  ;;  %v467_v54 = vrot.slane %v453_v50, %v3016_v41  ;;  %v2813_v50 = vld [vmem:[%s3535_s1 + $0x420] sm:$0xff]  }
  0x2d   :  { %2468 = vmatpush3.bf16.msra.mxu1 %v2707_v55  ;;  %2447 = vmatprep.subr.bf16.mxu0 %v2708_v56  ;;  %v2760_v55 = vld [vmem:[%s3535_s1 + $0x2b8] sm:$0xff]  }
  0x2e   :  { %2469 = vmatprep.subr.bf16.mxu1 %v2709_v57  ;;  %v469_v56 = vcombine.high %v467_v54, %v467_v54  ;;  %v2762_v57 = vld [vmem:[%s3535_s1 + $0x340] sm:$0xff]  }
  0x30   :  { %2448 = vmatpush3.bf16.msra.mxu0 %v2710_v58  ;;  %v2763_v58 = vld [vmem:[%s3535_s1 + $0x3c0] sm:$0xff]  }
  0x31   :  { %2470 = vmatpush3.bf16.msra.mxu1 %v2711_v59  ;;  %2449 = vmatprep.subr.bf16.mxu0 %v2712_v60  ;;  %v2764_v59 = vld [vmem:[%s3535_s1 + $0x300] sm:$0xff]  }
  0x32   :  { %2471 = vmatprep.subr.bf16.mxu1 %v2713_v61  ;;  %v2765_v60 = vld [vmem:[%s3535_s1 + $0x380] sm:$0xff]   ;;  %v2766_v61 = vld [vmem:[%s3535_s1 + $0x348] sm:$0xff]  }
  0x34   :  { %2450 = vmatpush3.bf16.msra.mxu0 %v2714_v62  ;;  %v2767_v62 = vld [vmem:[%s3535_s1 + $0x3c8] sm:$0xff]  }
  0x35   :  { %2472 = vmatpush3.bf16.msra.mxu1 %v2715_v63  ;;  %2451 = vmatprep.subr.bf16.mxu0 %v2716_v0  ;;  %v2768_v63 = vld [vmem:[%s3535_s1 + $0x308] sm:$0xff]  }
  0x36   :  { %2473 = vmatprep.subr.bf16.mxu1 %v2717_v1  ;;  %v2769_v0 = vld [vmem:[%s3535_s1 + $0x388] sm:$0xff]   ;;  %v2770_v1 = vld [vmem:[%s3535_s1 + $0x350] sm:$0xff]  }
  0x38   :  { %2452 = vmatpush3.bf16.msra.mxu0 %v2718_v2  ;;  %v2771_v2 = vld [vmem:[%s3535_s1 + $0x3d0] sm:$0xff]  }
  0x39   :  { %2474 = vmatpush3.bf16.msra.mxu1 %v2719_v3  ;;  %2453 = vmatprep.subr.bf16.mxu0 %v2720_v4  ;;  %v2772_v3 = vld [vmem:[%s3535_s1 + $0x310] sm:$0xff]  }
  0x3a   :  { %2475 = vmatprep.subr.bf16.mxu1 %v2721_v5  ;;  %v2773_v4 = vld [vmem:[%s3535_s1 + $0x390] sm:$0xff]   ;;  %v2774_v5 = vld [vmem:[%s3535_s1 + $0x358] sm:$0xff]  }
  0x3c   :  { %2454 = vmatpush3.bf16.msra.mxu0 %v2722_v6  ;;  %v2775_v6 = vld [vmem:[%s3535_s1 + $0x3d8] sm:$0xff]  }
  0x3d   :  { %2476 = vmatpush3.bf16.msra.mxu1 %v2723_v7  ;;  %2455 = vmatprep.subr.bf16.mxu0 %v2724_v9  ;;  %v2776_v7 = vld [vmem:[%s3535_s1 + $0x318] sm:$0xff]   ;;  %v2778_v9 = vld [vmem:[%s3535_s1 + $0x360] sm:$0xff]  }
  0x3e   :  { %2477 = vmatprep.subr.bf16.mxu1 %v2725_v12  ;;  %v2781_v12 = vld [vmem:[%s3535_s1 + $0x3a0] sm:$0xff]  }
  0x40   :  { %2456 = vmatpush3.bf16.msra.mxu0 %v2726_v13  ;;  %v2782_v13 = vld [vmem:[%s3535_s1 + $0x368] sm:$0xff]  }
  0x41   :  { %2478 = vmatpush3.bf16.msra.mxu1 %v2727_v16  ;;  %2485 = vmatprep.subr.bf16.mxu0 %v2729_v18  ;;  %v2785_v16 = vld [vmem:[%s3535_s1 + $0x3a8] sm:$0xff]   ;;  %v2787_v18 = vld [vmem:[%s3535_s1 + $0x3f0] sm:$0xff]  }
  0x42   :  { %2507 = vmatprep.subr.bf16.mxu1 %v2730_v19  ;;  %v2788_v19 = vld [vmem:[%s3535_s1 + $0x330] sm:$0xff]  }
  0x43   :  { %1810 = vmatmul.mubr.bf16.vlgmr.msra.gmra.mrb[4].mxu0 %v443_v10  ;;  %v2779_v10 = vld [vmem:[%s3535_s1 + $0x3e0] sm:$0xff]  }
  0x44   :  { %1850 = vmatmul.mubr.bf16.vlgmr.msra.gmra.mrb[4].mxu1 %v450_v15  ;;  %2486 = vmatpush3.bf16.msra.mxu0 %v2731_v20  ;;  %v2784_v15 = vld [vmem:[%s3535_s1 + $0x328] sm:$0xff]   ;;  %v2789_v20 = vld [vmem:[%s3535_s1 + $0x3b0] sm:$0xff]  }
  0x45   :  { %2508 = vmatpush3.bf16.msra.mxu1 %v2732_v21  ;;  %2487 = vmatprep.subr.bf16.mxu0 %v2733_v22  ;;  %v2790_v21 = vld [vmem:[%s3535_s1 + $0x378] sm:$0xff]  }
  0x46   :  { %2509 = vmatprep.subr.bf16.mxu1 %v2734_v23  ;;  %1889 = vmatprep.mubr.bf16.mxu0 %v468_v53  ;;  %v19_v22 = vld [vmem:[%s3534_s0 + $0x18] sm:$0xff]  ;;  %v2816_v53 = vld [vmem:[%s3535_s1 + $0x4e8] sm:$0xff]  }
  0x47   :  { %1929 = vmatprep.mubr.bf16.mxu1 %v469_v56  ;;  %v2791_v23 = vld [vmem:[%s3535_s1 + $0x3f8] sm:$0xff]   ;;  %v2819_v56 = vld [vmem:[%s3535_s1 + $0x470] sm:$0xff]  }
  0x48   :  { %2488 = vmatpush3.bf16.msra.mxu0 %v2735_v24  ;;  %v477_v24 = vrot.slane %v19_v22, %v3016_v41 }
  0x49   :  { %2510 = vmatpush3.bf16.msra.mxu1 %v2736_v25  ;;  %2489 = vmatprep.subr.bf16.mxu0 %v2737_v26  ;;  %v470_v25 = vcombine.high %v19_v22, %v19_v22  ;;  %v2792_v26 = vld [vmem:[%s3535_s1 + $0x338] sm:$0xff]   ;;  %v2844_v22 = vld [vmem:[%s3535_s1 + $0x560] sm:$0xff]  }
  0x4a   :  { %2511 = vmatprep.subr.bf16.mxu1 %v2738_v27  ;;  %v2793_v27 = vld [vmem:[%s3535_s1 + $0x3b8] sm:$0xff]  }
  0x4c   :  { %2490 = vmatpush3.bf16.msra.mxu0 %v2739_v28  ;;  %v485_v28 = vcombine.high %v477_v24, %v477_v24 }
  0x4d   :  { %2512 = vmatpush3.bf16.msra.mxu1 %v2740_v29  ;;  %2491 = vmatprep.subr.bf16.mxu0 %v2741_v30  ;;  %v484_v29 = vrot.slane %v470_v25, %v3016_v41  ;;  %v2795_v30 = vld [vmem:[%s3535_s1 + $0x440] sm:$0xff]  }
  0x4e   :  { %2513 = vmatprep.subr.bf16.mxu1 %v2742_v31  ;;  %v2847_v25 = vld [vmem:[%s3535_s1 + $0x5a0] sm:$0xff]  }
  0x4f   :  { %v486_v31 = vcombine.high %v484_v29, %v484_v29 }
  0x50   :  { %2492 = vmatpush3.bf16.msra.mxu0 %v2743_v32  ;;  %v2796_v32 = vld [vmem:[%s3535_s1 + $0x4c0] sm:$0xff]  }
  0x51   :  { %2514 = vmatpush3.bf16.msra.mxu1 %v2744_v33  ;;  %2493 = vmatprep.subr.bf16.mxu0 %v2745_v34  ;;  %v2797_v33 = vld [vmem:[%s3535_s1 + $0x400] sm:$0xff]  }
  0x52   :  { %2515 = vmatprep.subr.bf16.mxu1 %v2746_v35  ;;  %v2798_v34 = vld [vmem:[%s3535_s1 + $0x480] sm:$0xff]   ;;  %v2799_v35 = vld [vmem:[%s3535_s1 + $0x448] sm:$0xff]  }
  0x54   :  { %2494 = vmatpush3.bf16.msra.mxu0 %v2747_v36  ;;  %v2800_v36 = vld [vmem:[%s3535_s1 + $0x4c8] sm:$0xff]  }
  0x55   :  { %2516 = vmatpush3.bf16.msra.mxu1 %v2748_v37  ;;  %2495 = vmatprep.subr.bf16.mxu0 %v2749_v38  ;;  %v2801_v37 = vld [vmem:[%s3535_s1 + $0x408] sm:$0xff]  }
  0x56   :  { %2517 = vmatprep.subr.bf16.mxu1 %v2750_v39  ;;  %v2802_v38 = vld [vmem:[%s3535_s1 + $0x488] sm:$0xff]   ;;  %v2803_v39 = vld [vmem:[%s3535_s1 + $0x450] sm:$0xff]  }
  0x58   :  { %2496 = vmatpush3.bf16.msra.mxu0 %v2751_v40  ;;  %v2804_v40 = vld [vmem:[%s3535_s1 + $0x4d0] sm:$0xff]  }
  0x59   :  { %2518 = vmatpush3.bf16.msra.mxu1 %v2752_v42  ;;  %2497 = vmatprep.subr.bf16.mxu0 %v2753_v43  ;;  %v2805_v42 = vld [vmem:[%s3535_s1 + $0x410] sm:$0xff]  }
  0x5a   :  { %2519 = vmatprep.subr.bf16.mxu1 %v2754_v44  ;;  %v2806_v43 = vld [vmem:[%s3535_s1 + $0x490] sm:$0xff]   ;;  %v2807_v44 = vld [vmem:[%s3535_s1 + $0x458] sm:$0xff]  }
  0x5c   :  { %2498 = vmatpush3.bf16.msra.mxu0 %v2755_v45  ;;  %v2808_v45 = vld [vmem:[%s3535_s1 + $0x4d8] sm:$0xff]  }
  0x5d   :  { %2520 = vmatpush3.bf16.msra.mxu1 %v2756_v46  ;;  %2499 = vmatprep.subr.bf16.mxu0 %v2757_v48  ;;  %v2809_v46 = vld [vmem:[%s3535_s1 + $0x418] sm:$0xff]   ;;  %v2811_v48 = vld [vmem:[%s3535_s1 + $0x460] sm:$0xff]  }
  0x5e   :  { %2521 = vmatprep.subr.bf16.mxu1 %v2758_v51  ;;  %v2814_v51 = vld [vmem:[%s3535_s1 + $0x4a0] sm:$0xff]  }
  0x60   :  { %2500 = vmatpush3.bf16.msra.mxu0 %v2759_v52  ;;  %v2815_v52 = vld [vmem:[%s3535_s1 + $0x468] sm:$0xff]  }
  0x61   :  { %2522 = vmatpush3.bf16.msra.mxu1 %v2760_v55  ;;  %2529 = vmatprep.subr.bf16.mxu0 %v2762_v57  ;;  %v2818_v55 = vld [vmem:[%s3535_s1 + $0x4a8] sm:$0xff]   ;;  %v2820_v57 = vld [vmem:[%s3535_s1 + $0x4f0] sm:$0xff]  }
  0x62   :  { %2551 = vmatprep.subr.bf16.mxu1 %v2763_v58  ;;  %v2821_v58 = vld [vmem:[%s3535_s1 + $0x430] sm:$0xff]  }
  0x63   :  { %1890 = vmatmul.mubr.bf16.vlgmr.msra.gmra.mrb[8].mxu0 %v460_v49  ;;  %v2812_v49 = vld [vmem:[%s3535_s1 + $0x4e0] sm:$0xff]  }
  0x64   :  { %1930 = vmatmul.mubr.bf16.vlgmr.msra.gmra.mrb[8].mxu1 %v467_v54  ;;  %2530 = vmatpush3.bf16.msra.mxu0 %v2764_v59  ;;  %v2817_v54 = vld [vmem:[%s3535_s1 + $0x428] sm:$0xff]   ;;  %v2822_v59 = vld [vmem:[%s3535_s1 + $0x4b0] sm:$0xff]  }
  0x65   :  { %2552 = vmatpush3.bf16.msra.mxu1 %v2765_v60  ;;  %2531 = vmatprep.subr.bf16.mxu0 %v2766_v61  ;;  %v2823_v60 = vld [vmem:[%s3535_s1 + $0x478] sm:$0xff]   ;;  %v20_v61 = vld [vmem:[%s3534_s0 + $0x20] sm:$0xff] }
  0x66   :  { %2553 = vmatprep.subr.bf16.mxu1 %v2767_v62  ;;  %1969 = vmatprep.mubr.bf16.mxu0 %v485_v28  ;;  %v2824_v62 = vld [vmem:[%s3535_s1 + $0x4f8] sm:$0xff]   ;;  %v2850_v28 = vld [vmem:[%s3535_s1 + $0x528] sm:$0xff]  }
  0x67   :  { %2009 = vmatprep.mubr.bf16.mxu1 %v486_v31  ;;  %v2853_v31 = vld [vmem:[%s3535_s1 + $0x5f0] sm:$0xff]  }
  0x68   :  { %2532 = vmatpush3.bf16.msra.mxu0 %v2768_v63  ;;  %v494_v63 = vrot.slane %v20_v61, %v3016_v41 }
  0x69   :  { %2554 = vmatpush3.bf16.msra.mxu1 %v2769_v0  ;;  %2533 = vmatprep.subr.bf16.mxu0 %v2770_v1  ;;  %v487_v0 = vcombine.high %v20_v61, %v20_v61  ;;  %v2825_v1 = vld [vmem:[%s3535_s1 + $0x438] sm:$0xff]  }
  0x6a   :  { %2555 = vmatprep.subr.bf16.mxu1 %v2771_v2  ;;  %v2826_v2 = vld [vmem:[%s3535_s1 + $0x4b8] sm:$0xff]  }
  0x6c   :  { %2534 = vmatpush3.bf16.msra.mxu0 %v2772_v3  ;;  %v502_v3 = vcombine.high %v494_v63, %v494_v63 }
  0x6d   :  { %2556 = vmatpush3.bf16.msra.mxu1 %v2773_v4  ;;  %2535 = vmatprep.subr.bf16.mxu0 %v2774_v5  ;;  %v501_v4 = vrot.slane %v487_v0, %v3016_v41  ;;  %v2828_v5 = vld [vmem:[%s3535_s1 + $0x540] sm:$0xff]  }
  0x6e   :  { %2557 = vmatprep.subr.bf16.mxu1 %v2775_v6 }
  0x6f   :  { %v503_v6 = vcombine.high %v501_v4, %v501_v4 }
  0x70   :  { %2536 = vmatpush3.bf16.msra.mxu0 %v2776_v7  ;;  %v2829_v7 = vld [vmem:[%s3535_s1 + $0x5c0] sm:$0xff]  }
  0x71   :  { %2558 = vmatpush3.bf16.msra.mxu1 %v2777_v8  ;;  %2537 = vmatprep.subr.bf16.mxu0 %v2778_v9  ;;  %v2830_v8 = vld [vmem:[%s3535_s1 + $0x500] sm:$0xff]  }
  0x72   :  { %2559 = vmatprep.subr.bf16.mxu1 %v2779_v10  ;;  %v2831_v9 = vld [vmem:[%s3535_s1 + $0x580] sm:$0xff]   ;;  %v2832_v10 = vld [vmem:[%s3535_s1 + $0x548] sm:$0xff]  }
  0x74   :  { %2538 = vmatpush3.bf16.msra.mxu0 %v2780_v11  ;;  %v2833_v11 = vld [vmem:[%s3535_s1 + $0x5c8] sm:$0xff]  }
  0x75   :  { %2560 = vmatpush3.bf16.msra.mxu1 %v2781_v12  ;;  %2539 = vmatprep.subr.bf16.mxu0 %v2782_v13  ;;  %v2834_v12 = vld [vmem:[%s3535_s1 + $0x508] sm:$0xff]  }
  0x76   :  { %2561 = vmatprep.subr.bf16.mxu1 %v2783_v14  ;;  %v2835_v13 = vld [vmem:[%s3535_s1 + $0x588] sm:$0xff]   ;;  %v2836_v14 = vld [vmem:[%s3535_s1 + $0x550] sm:$0xff]  }
  0x78   :  { %2540 = vmatpush3.bf16.msra.mxu0 %v2784_v15  ;;  %v2837_v15 = vld [vmem:[%s3535_s1 + $0x5d0] sm:$0xff]  }
  0x79   :  { %2562 = vmatpush3.bf16.msra.mxu1 %v2785_v16  ;;  %2541 = vmatprep.subr.bf16.mxu0 %v2786_v17  ;;  %v2838_v16 = vld [vmem:[%s3535_s1 + $0x510] sm:$0xff]  }
  0x7a   :  { %2563 = vmatprep.subr.bf16.mxu1 %v2787_v18  ;;  %v2839_v17 = vld [vmem:[%s3535_s1 + $0x590] sm:$0xff]   ;;  %v2840_v18 = vld [vmem:[%s3535_s1 + $0x558] sm:$0xff]  }
  0x7c   :  { %2542 = vmatpush3.bf16.msra.mxu0 %v2788_v19  ;;  %v2841_v19 = vld [vmem:[%s3535_s1 + $0x5d8] sm:$0xff]  }
  0x7d   :  { %2564 = vmatpush3.bf16.msra.mxu1 %v2789_v20  ;;  %2543 = vmatprep.subr.bf16.mxu0 %v2790_v21  ;;  %v2842_v20 = vld [vmem:[%s3535_s1 + $0x518] sm:$0xff]  }
  0x7e   :  { %2565 = vmatprep.subr.bf16.mxu1 %v2791_v23  ;;  %v2843_v21 = vld [vmem:[%s3535_s1 + $0x598] sm:$0xff]   ;;  %v2845_v23 = vld [vmem:[%s3535_s1 + $0x5e0] sm:$0xff]  }
  0x80   :  { %2544 = vmatpush3.bf16.msra.mxu0 %v2792_v26  ;;  %v2848_v26 = vld [vmem:[%s3535_s1 + $0x568] sm:$0xff]  }
  0x81   :  { %2566 = vmatpush3.bf16.msra.mxu1 %v2793_v27  ;;  %2573 = vmatprep.subr.bf16.mxu0 %v2795_v30  ;;  %v2849_v27 = vld [vmem:[%s3535_s1 + $0x5e8] sm:$0xff]   ;;  %v2852_v30 = vld [vmem:[%s3535_s1 + $0x570] sm:$0xff]  }
  0x82   :  { %2595 = vmatprep.subr.bf16.mxu1 %v2796_v32  ;;  %v2854_v32 = vld [vmem:[%s3535_s1 + $0x530] sm:$0xff]  }
  0x83   :  { %1970 = vmatmul.mubr.bf16.vlgmr.msra.gmra.mrb[12].mxu0 %v477_v24  ;;  %v2846_v24 = vld [vmem:[%s3535_s1 + $0x520] sm:$0xff]  }
  0x84   :  { %2010 = vmatmul.mubr.bf16.vlgmr.msra.gmra.mrb[12].mxu1 %v484_v29  ;;  %2574 = vmatpush3.bf16.msra.mxu0 %v2797_v33  ;;  %v2851_v29 = vld [vmem:[%s3535_s1 + $0x5a8] sm:$0xff]   ;;  %v2855_v33 = vld [vmem:[%s3535_s1 + $0x5b0] sm:$0xff]  }
  0x85   :  { %2596 = vmatpush3.bf16.msra.mxu1 %v2798_v34  ;;  %2575 = vmatprep.subr.bf16.mxu0 %v2799_v35  ;;  %v21_v34 = vld [vmem:[%s3534_s0 + $0x28] sm:$0xff]  ;;  %v2856_v35 = vld [vmem:[%s3535_s1 + $0x578] sm:$0xff]  }
  0x86   :  { %2597 = vmatprep.subr.bf16.mxu1 %v2800_v36  ;;  %2049 = vmatprep.mubr.bf16.mxu0 %v502_v3  ;;  %v2857_v36 = vld [vmem:[%s3535_s1 + $0x5f8] sm:$0xff]  }
  0x87   :  { %2089 = vmatprep.mubr.bf16.mxu1 %v503_v6 }
  0x88   :  { %2576 = vmatpush3.bf16.msra.mxu0 %v2801_v37  ;;  %v511_v37 = vrot.slane %v21_v34, %v3016_v41 }
  0x89   :  { %2598 = vmatpush3.bf16.msra.mxu1 %v2802_v38  ;;  %2577 = vmatprep.subr.bf16.mxu0 %v2803_v39  ;;  %v504_v38 = vcombine.high %v21_v34, %v21_v34 }
  0x8a   :  { %2599 = vmatprep.subr.bf16.mxu1 %v2804_v40 }
  0x8c   :  { %2578 = vmatpush3.bf16.msra.mxu0 %v2805_v42 }
  0x8d   :  { %2600 = vmatpush3.bf16.msra.mxu1 %v2806_v43  ;;  %2579 = vmatprep.subr.bf16.mxu0 %v2807_v44 }
  0x8e   :  { %2601 = vmatprep.subr.bf16.mxu1 %v2808_v45 }
  0x90   :  { %2580 = vmatpush3.bf16.msra.mxu0 %v2809_v46 }
  0x91   :  { %2602 = vmatpush3.bf16.msra.mxu1 %v2810_v47  ;;  %2581 = vmatprep.subr.bf16.mxu0 %v2811_v48 }
  0x92   :  { %2603 = vmatprep.subr.bf16.mxu1 %v2812_v49 }
  0x94   :  { %2582 = vmatpush3.bf16.msra.mxu0 %v2813_v50 }
  0x95   :  { %2604 = vmatpush3.bf16.msra.mxu1 %v2814_v51  ;;  %2583 = vmatprep.subr.bf16.mxu0 %v2815_v52 }
  0x96   :  { %2605 = vmatprep.subr.bf16.mxu1 %v2816_v53 }
  0x98   :  { %2584 = vmatpush3.bf16.msra.mxu0 %v2817_v54 }
  0x99   :  { %2606 = vmatpush3.bf16.msra.mxu1 %v2818_v55  ;;  %2585 = vmatprep.subr.bf16.mxu0 %v2819_v56 }
  0x9a   :  { %2607 = vmatprep.subr.bf16.mxu1 %v2820_v57 }
  0x9c   :  { %2586 = vmatpush3.bf16.msra.mxu0 %v2821_v58 }
  0x9d   :  { %2608 = vmatpush3.bf16.msra.mxu1 %v2822_v59  ;;  %2587 = vmatprep.subr.bf16.mxu0 %v2823_v60 }
  0x9e   :  { %2609 = vmatprep.subr.bf16.mxu1 %v2824_v62 }
  0xa0   :  { %2588 = vmatpush3.bf16.msra.mxu0 %v2825_v1 }
  0xa1   :  { %2610 = vmatpush3.bf16.msra.mxu1 %v2826_v2  ;;  %2617 = vmatprep.subr.bf16.mxu0 %v2828_v5 }
  0xa2   :  { %2639 = vmatprep.subr.bf16.mxu1 %v2829_v7 }
  0xa3   :  { %2050 = vmatmul.mubr.bf16.vlgmr.msra.gmra.mrb[16].mxu0 %v494_v63 }
  0xa4   :  { %2090 = vmatmul.mubr.bf16.vlgmr.msra.gmra.mrb[16].mxu1 %v501_v4  ;;  %2618 = vmatpush3.bf16.msra.mxu0 %v2830_v8 }
  0xa5   :  { %2640 = vmatpush3.bf16.msra.mxu1 %v2831_v9  ;;  %2619 = vmatprep.subr.bf16.mxu0 %v2832_v10 }
  0xa6   :  { %2641 = vmatprep.subr.bf16.mxu1 %v2833_v11 }
  0xa8   :  { %2620 = vmatpush3.bf16.msra.mxu0 %v2834_v12 }
  0xa9   :  { %2642 = vmatpush3.bf16.msra.mxu1 %v2835_v13  ;;  %2621 = vmatprep.subr.bf16.mxu0 %v2836_v14 }
  0xaa   :  { %2643 = vmatprep.subr.bf16.mxu1 %v2837_v15 }
  0xac   :  { %2622 = vmatpush3.bf16.msra.mxu0 %v2838_v16 }
  0xad   :  { %2644 = vmatpush3.bf16.msra.mxu1 %v2839_v17  ;;  %2623 = vmatprep.subr.bf16.mxu0 %v2840_v18 }
  0xae   :  { %2645 = vmatprep.subr.bf16.mxu1 %v2841_v19 }
  0xb0   :  { %2624 = vmatpush3.bf16.msra.mxu0 %v2842_v20 }
  0xb1   :  { %2646 = vmatpush3.bf16.msra.mxu1 %v2843_v21  ;;  %2625 = vmatprep.subr.bf16.mxu0 %v2844_v22 }
  0xb2   :  { %2647 = vmatprep.subr.bf16.mxu1 %v2845_v23 }
  0xb4   :  { %2626 = vmatpush3.bf16.msra.mxu0 %v2846_v24 }
  0xb5   :  { %2648 = vmatpush3.bf16.msra.mxu1 %v2847_v25  ;;  %2627 = vmatprep.subr.bf16.mxu0 %v2848_v26 }
  0xb6   :  { %2649 = vmatprep.subr.bf16.mxu1 %v2849_v27 }
  0xb8   :  { %2628 = vmatpush3.bf16.msra.mxu0 %v2850_v28 }
  0xb9   :  { %2650 = vmatpush3.bf16.msra.mxu1 %v2851_v29  ;;  %2629 = vmatprep.subr.bf16.mxu0 %v2852_v30 }
  0xba   :  { %2651 = vmatprep.subr.bf16.mxu1 %v2853_v31 }
  0xbb   :  { %8 = vsyncpa [#allocation3], 0  ;;  %v519_v39 = vcombine.high %v511_v37, %v511_v37  ;;  %v518_v40 = vrot.slane %v504_v38, %v3016_v41  ;;  %v2858_v42 = vld [vmem:[%s3535_s1 + $0x538] sm:$0xff]   ;;  %v2204_v46 = vld [vmem:[%s3536_s2] ss:$0 sm:$0xff]  ;;  %vm2177_vm0 = vcmask 1043456  }
  0xbc   :  { %2630 = vmatpush3.bf16.msra.mxu0 %v2854_v32  ;;  %v2859_v43 = vld [vmem:[%s3535_s1 + $0x5b8] sm:$0xff]   ;;  %s2890_s1 = smov [#allocation2]  }
  0xbd   :  { %2652 = vmatpush3.bf16.msra.mxu1 %v2855_v33  ;;  %2631 = vmatprep.subr.bf16.mxu0 %v2856_v35  ;;  %v520_v44 = vcombine.high %v518_v40, %v518_v40  ;;  %s2196_s2 = sshll.u32 %s2890_s1, 4  ;;  %s2197_s2 = int_to_ptr.vmem [resolvable:$true] %s2196_s2 }
  0xbe   :  { %2653 = vmatprep.subr.bf16.mxu1 %v2857_v36  ;;  %2129 = vmatprep.mubr.bf16.mxu0 %v519_v39  ;;  %s2865_s4 = scalar_lea.vmem %s2197_s2, 64  ;;  %p2870_p1 = scmp.lt.s32.totalorder %s2197_s2, %s2197_s2 }
  0xbf   :  { %2169 = vmatprep.mubr.bf16.mxu1 %v520_v44  ;;  %p2866_p0 = scmp.ne.s32.totalorder %s2197_s2, %s2865_s4  ;;  %p2871_p2 = scmp.lt.s32.totalorder %s2865_s4, %s2865_s4 }
  0xc0   :  { %2632 = vmatpush3.bf16.msra.mxu0 %v2858_v42 }
  0xc1   :  { %2654 = vmatpush3.bf16.msra.mxu1 %v2859_v43  ;;  %p2872_p3 = por %p2871_p2, %p2870_p1 }
  0xc3   :  { %2130 = vmatmul.mubr.bf16.vlgmr.msra.gmra.mrb[20].mxu0 %v511_v37  ;;  %p2873_p4 = pnand %p2872_p3, %p2866_p0 }
  0xc4   :  { %2170 = vmatmul.mubr.bf16.vlgmr.msra.gmra.mrb[20].mxu1 %v518_v40 }
  0xf6   :  { %v2413_v41 = vpop.f32.mrb[0].mxu0 }
  0xf7   :  { %v2435_v45 = vpop.f32.mrb[0].mxu1  ;;  %v2414_v47 = vpop.f32.mrb[1].mxu0 }
  0xf8   :  { %v2436_v48 = vpop.f32.mrb[1].mxu1  ;;  %v2415_v49 = vadd.f32 %v2414_v47, %v2413_v41  ;;  %v2416_v51 = vpop.f32.mrb[2].mxu0 }
  0xf9   :  { %v2437_v50 = vadd.f32 %v2436_v48, %v2435_v45  ;;  %v2438_v52 = vpop.f32.mrb[2].mxu1  ;;  %v2417_v53 = vpop.f32.mrb[3].mxu0 }
  0xfa   :  { %v2439_v54 = vpop.f32.mrb[3].mxu1  ;;  %v1732_v55 = vadd.f32 %v2415_v49, %v2204_v46 }
  0xfc   :  { %v1772_v56 = vadd.f32 %v2437_v50, %v1732_v55 }
 0x116   :  { %v2457_v57 = vpop.f32.mrb[4].mxu0 }
 0x117   :  { %v2479_v58 = vpop.f32.mrb[4].mxu1  ;;  %v2458_v59 = vpop.f32.mrb[5].mxu0 }
 0x118   :  { %v2480_v60 = vpop.f32.mrb[5].mxu1  ;;  %v2459_v61 = vadd.f32 %v2458_v59, %v2457_v57  ;;  %v2460_v63 = vpop.f32.mrb[6].mxu0 }
 0x119   :  { %v2481_v62 = vadd.f32 %v2480_v60, %v2479_v58  ;;  %v2482_v0 = vpop.f32.mrb[6].mxu1  ;;  %v2461_v1 = vpop.f32.mrb[7].mxu0 }
 0x11a   :  { %v2483_v2 = vpop.f32.mrb[7].mxu1  ;;  %v1812_v3 = vadd.f32 %v2459_v61, %v1772_v56 }
 0x11c   :  { %v1852_v4 = vadd.f32 %v2481_v62, %v1812_v3 }
 0x136   :  { %v2501_v5 = vpop.f32.mrb[8].mxu0 }
 0x137   :  { %v2523_v6 = vpop.f32.mrb[8].mxu1  ;;  %v2502_v7 = vpop.f32.mrb[9].mxu0 }
 0x138   :  { %v2524_v8 = vpop.f32.mrb[9].mxu1  ;;  %v2503_v9 = vadd.f32 %v2502_v7, %v2501_v5  ;;  %v2504_v11 = vpop.f32.mrb[10].mxu0 }
 0x139   :  { %v2525_v10 = vadd.f32 %v2524_v8, %v2523_v6  ;;  %v2526_v12 = vpop.f32.mrb[10].mxu1  ;;  %v2505_v13 = vpop.f32.mrb[11].mxu0 }
 0x13a   :  { %v2527_v14 = vpop.f32.mrb[11].mxu1  ;;  %v1892_v15 = vadd.f32 %v2503_v9, %v1852_v4 }
 0x13c   :  { %v1932_v16 = vadd.f32 %v2525_v10, %v1892_v15 }
 0x156   :  { %v2545_v17 = vpop.f32.mrb[12].mxu0 }
 0x157   :  { %v2567_v18 = vpop.f32.mrb[12].mxu1  ;;  %v2546_v19 = vpop.f32.mrb[13].mxu0 }
 0x158   :  { %v2568_v20 = vpop.f32.mrb[13].mxu1  ;;  %v2547_v21 = vadd.f32 %v2546_v19, %v2545_v17  ;;  %v2548_v23 = vpop.f32.mrb[14].mxu0 }
 0x159   :  { %v2569_v22 = vadd.f32 %v2568_v20, %v2567_v18  ;;  %v2570_v24 = vpop.f32.mrb[14].mxu1  ;;  %v2549_v25 = vpop.f32.mrb[15].mxu0 }
 0x15a   :  { %v2571_v26 = vpop.f32.mrb[15].mxu1  ;;  %v1972_v27 = vadd.f32 %v2547_v21, %v1932_v16 }
 0x15c   :  { %v2012_v28 = vadd.f32 %v2569_v22, %v1972_v27 }
 0x176   :  { %v2589_v29 = vpop.f32.mrb[16].mxu0 }
 0x177   :  { %v2611_v30 = vpop.f32.mrb[16].mxu1  ;;  %v2590_v31 = vpop.f32.mrb[17].mxu0 }
 0x178   :  { %v2612_v32 = vpop.f32.mrb[17].mxu1  ;;  %v2591_v33 = vadd.f32 %v2590_v31, %v2589_v29  ;;  %v2592_v35 = vpop.f32.mrb[18].mxu0 }
 0x179   :  { %v2613_v34 = vadd.f32 %v2612_v32, %v2611_v30  ;;  %v2614_v36 = vpop.f32.mrb[18].mxu1  ;;  %v2593_v37 = vpop.f32.mrb[19].mxu0 }
 0x17a   :  { %v2615_v38 = vpop.f32.mrb[19].mxu1  ;;  %v2052_v39 = vadd.f32 %v2591_v33, %v2012_v28 }
 0x17c   :  { %v2092_v40 = vadd.f32 %v2613_v34, %v2052_v39 }
 0x196   :  { %v2633_v42 = vpop.f32.mrb[20].mxu0 }
 0x197   :  { %v2655_v43 = vpop.f32.mrb[20].mxu1  ;;  %v2634_v44 = vpop.f32.mrb[21].mxu0 }
 0x198   :  { %v2656_v41 = vpop.f32.mrb[21].mxu1  ;;  %v2635_v45 = vadd.f32 %v2634_v44, %v2633_v42  ;;  %v2636_v47 = vpop.f32.mrb[22].mxu0 }
 0x199   :  { %v2657_v46 = vadd.f32 %v2656_v41, %v2655_v43  ;;  %v2658_v48 = vpop.f32.mrb[22].mxu1  ;;  %v2637_v49 = vpop.f32.mrb[23].mxu0 }
 0x19a   :  { %v2659_v50 = vpop.f32.mrb[23].mxu1  ;;  %v2132_v51 = vadd.f32 %v2635_v45, %v2092_v40 }
 0x19c   :  { %v2172_v52 = vadd.f32 %v2657_v46, %v2132_v51 }
 0x19e   :  { %v2178_v53 = vsel %vm2177_vm0, %v2172_v52, -inf }
 0x19f   :  { %2179 = vmax.xlane.f32.xlu0 %v2178_v53 }
 0x22c   :  { %v2180_v54 = vpop.xlane.xlu0 %2179 }
 0x22d   :  { %v2181_v55 = vsub.f32 %v2172_v52, %v2180_v54 }
 0x22f   :  { %v2182_v56 = vmul.f32 1.442695, %v2181_v55 }
 0x231   :  { %2861 = vpow2.f32 %v2182_v56 }
 0x23b   :  { %v2862_v57 = vpop.eup %2861 }
 0x23c   :  { %v2184_v58 = vsel %vm2177_vm0, %v2862_v57, 0.0 }
 0x23d   :  { %2185 = vadd.xlane.f32.xlu0 %v2184_v58 }
 0x2ca   :  { %v2186_v59 = vpop.xlane.xlu0 %2185 }
 0x2cb   :  { %2863 = vrcp.f32 %v2186_v59 }
 0x2d5   :  { %v2864_v60 = vpop.eup %2863 }
 0x2d6   :  { %v2188_v61 = vmul.f32 %v2864_v60, %v2862_v57 }
 0x2d8   :  { %2189 = vst [vmem:[#allocation2] sm:$0xf] %v2188_v61 }
 0x2d9   :  { %2876 = shalt.err (!%p2873_p4)
}
 0x2da   :  { %s2877_s7 = scalar_lea.hbm %s3537_s3, 64 }
 0x2db   :  { %p2878_p5 = scmp.ne.s32.totalorder %s3537_s3, %s2877_s7  ;;  %p2881_p6 = scmp.lt.u32.totalorder %s2877_s7, %s3537_s3 }
 0x2dd   :  { %p2883_p7 = pnand %p2881_p6, %p2878_p5 }
 0x2df   :  { %2886 = shalt.err (!%p2883_p7)
}
 0x2e0   :  { %2199 = dma.vmem_to_hbm [thread:$0]  %s2197_s2, 64, %s3537_s3, [#allocation3]  }
 0x2e1   :  { %2887 = dma.done.wait [#allocation3], 64  }
 0x2e2   :  { %2888 = vsyncadd [#allocation3], 4294967232 }
 0x2e3   :  { %2203 = vsyncpa [#allocation3], 1 }

</bundles_post_ra>
